<compile_context>
chip_gen: v7x
topology: tpu7x:2x2x1
jax: 0.10.0
libtpu: 0.0.40
codegen_flags: <defaults>
</compile_context>

<pallas_src>
from functools import partial

import jax
import jax.numpy as jnp
from jax.experimental import pallas as pl
from jax.experimental.pallas import tpu as pltpu


def gated_attn_pool_kernel(x_ref, w_ref, b_ref, o_ref, *, use_mxu):
    # x_ref: (TB, S, D) VMEM tile (f32 or bf16)
    # w_ref: (D, 2) if use_mxu else (2, D), in x.dtype
    # b_ref: (1, 2) f32 VMEM, [b_attn, b_gate]
    # o_ref: (TB, D) VMEM tile
    TB, S, D = x_ref.shape
    x = x_ref[...]

    if use_mxu:
        # One fused MXU projection: (TB*S, D) @ (D, 2).  Merging (TB, S) is a
        # free relayout because the wrapper guarantees S % packed_sublanes == 0.
        x2 = x.reshape(TB * S, D)
        proj = jnp.dot(x2, w_ref[...], preferred_element_type=jnp.float32)
        proj = (proj + b_ref[...]).reshape(TB, S, 2)      # fused bias add
        attn = proj[:, :, 0:1]                            # (TB, S, 1) f32
        gate_lin = proj[:, :, 1:2]                        # (TB, S, 1) f32
    else:
        # VPU fallback for S not a multiple of the packed sublane count:
        # broadcast-multiply + lane reduce (no reshapes across tile boundaries).
        wt = w_ref[...].astype(jnp.float32)               # (2, D), lane-dense rows
        wa = wt[0:1, :].reshape(1, 1, D)
        wg = wt[1:2, :].reshape(1, 1, D)
        xf = x.astype(jnp.float32)
        attn = jnp.sum(xf * wa, axis=-1, keepdims=True) + b_ref[0:1, 0:1]
        gate_lin = jnp.sum(xf * wg, axis=-1, keepdims=True) + b_ref[0:1, 1:2]

    scores = attn * jax.nn.sigmoid(gate_lin)              # (TB, S, 1) f32
    # TODO(synk): optional boolean `mask` argument (masked_fill with -inf) not
    # plumbed through; this implements the mask=None path only.

    # Softmax over the sequence axis with DEFERRED normalization: pool with
    # un-normalized exp-weights, scale the (TB, D) result once at the end.
    m = jnp.max(scores, axis=1, keepdims=True)            # (TB, 1, 1)
    e = jnp.exp(scores - m)                               # (TB, S, 1)
    denom = jnp.sum(e, axis=1)                            # (TB, 1)
    pooled = jnp.sum(e * x.astype(jnp.float32), axis=1)   # (TB, D) f32
    o_ref[...] = (pooled * pl.reciprocal(denom, approx=False)).astype(o_ref.dtype)


def _device_hints():
    """Best-effort (VMEM capacity, is-multi-core-chip) query; safe fallbacks."""
    vmem_cap = 64 * 1024 * 1024          # conservative default (v7x-sized)
    multi_core = False
    try:
        info = pltpu.get_tpu_info()
        vmem_cap = int(getattr(info, "vmem_capacity_bytes", vmem_cap))
    except Exception:
        pass
    try:
        kind = jax.devices()[0].device_kind.lower()
        multi_core = ("v7" in kind) or ("7x" in kind)
    except Exception:
        pass
    return vmem_cap, multi_core


def _pick_tb(B, S, D, itemsize, *, x_tile_target, pack, want_4_steps):
    """Batch-tile size: biggest tile under the target, layout-legal output block."""
    per_batch = max(1, S * D * itemsize)
    tb = max(1, x_tile_target // per_batch)
    tb = min(tb, B)
    if want_4_steps and B >= 4 * pack:
        # Multi-TensorCore chip: keep >= 4 grid steps (>= 2 per core) so each
        # core gets prefetch/compute overlap.
        tb = min(tb, max(pack, ((B // 4) // pack) * pack))
    if tb != B:
        # (TB, D) output block: TB must be a multiple of the packed sublane
        # count, or equal to B.
        tb = max(pack, (tb // pack) * pack)
        if tb >= B:
            tb = B
    return int(tb)


def _vmem_estimate(tb, S, D, itemsize):
    """Rough per-step VMEM footprint (double-buffered x + f32 temporaries)."""
    x_tile = tb * S * D * itemsize
    prod_f32 = tb * S * D * 4                              # e * x product (f32)
    score_tiles = tb * max(1, -(-S // 8))                  # (TB,S,1) padded to 128 lanes
    score_pads = 4 * score_tiles * 8 * 128 * 4             # ~4 such temps
    out_tiles = 2 * tb * D * 4
    return 2 * x_tile + prod_f32 + score_pads + out_tiles + 2 * D * itemsize + 4096


def gated_attn_pooling(x, w_attn, b_attn, w_gate, b_gate, *, tb=None):
    """x: (B, S, D) f32 or bf16.  Returns (B, D) in x.dtype (mask=None path)."""
    B, S, D = x.shape
    itemsize = jnp.dtype(x.dtype).itemsize
    pack = max(8, 32 // max(1, itemsize))        # 8 for f32, 16 for bf16
    use_mxu = (S % pack == 0)

    vmem_cap, multi_core = _device_hints()
    vmem_limit = int(min(64 * 1024 * 1024, (vmem_cap * 3) // 4))   # 48 MiB v7x, 64 MiB v5e/v6e
    x_tile_target = int(min(8 * 1024 * 1024, vmem_limit // 8))     # ~6-8 MiB x per step

    if tb is None:
        tb = _pick_tb(B, S, D, itemsize, x_tile_target=x_tile_target,
                      pack=pack, want_4_steps=multi_core)
    tb = int(tb)

    if _vmem_estimate(tb, S, D, itemsize) > vmem_limit:
        # TODO(synk): add a sequence-tiled ("arbitrary") second grid axis with
        # online-softmax accumulators for very large per-batch S*D footprints.
        raise NotImplementedError(
            "per-step working set exceeds the VMEM budget; sequence tiling is "
            "not implemented for this shape")

    # Fuse the two Linear(dim, 1) projections into one weight operand, in the
    # layout the selected in-kernel path wants (no in-kernel transpose).
    wa = jnp.asarray(w_attn).reshape(1, D)
    wg = jnp.asarray(w_gate).reshape(1, D)
    if use_mxu:
        w_arg = jnp.concatenate([wa.T, wg.T], axis=1).astype(x.dtype)   # (D, 2)
        w_block = (D, 2)
    else:
        w_arg = jnp.concatenate([wa, wg], axis=0).astype(x.dtype)       # (2, D)
        w_block = (2, D)
    b_arg = jnp.stack([jnp.asarray(b_attn, jnp.float32).reshape(()),
                       jnp.asarray(b_gate, jnp.float32).reshape(())]).reshape(1, 2)

    grid = (pl.cdiv(B, tb),)
    return pl.pallas_call(
        partial(gated_attn_pool_kernel, use_mxu=use_mxu),
        out_shape=jax.ShapeDtypeStruct((B, D), x.dtype),
        grid_spec=pltpu.PrefetchScalarGridSpec(
            num_scalar_prefetch=0,
            grid=grid,
            in_specs=[
                pl.BlockSpec((tb, S, D), lambda b: (b, 0, 0)),   # x tile
                pl.BlockSpec(w_block, lambda b: (0, 0)),         # fused weights
                pl.BlockSpec((1, 2), lambda b: (0, 0)),          # fused biases (f32)
            ],
            out_specs=pl.BlockSpec((tb, D), lambda b: (b, 0)),
        ),
        compiler_params=pltpu.CompilerParams(
            dimension_semantics=("parallel",),
            vmem_limit_bytes=vmem_limit,
        ),
    )(x, w_arg, b_arg)


def reference(x, w_attn, b_attn, w_gate, b_gate):
    xf = x.astype(jnp.float32)
    wa = jnp.asarray(w_attn, jnp.float32).reshape(-1)
    wg = jnp.asarray(w_gate, jnp.float32).reshape(-1)
    ba = jnp.asarray(b_attn, jnp.float32).reshape(())
    bg = jnp.asarray(b_gate, jnp.float32).reshape(())
    attn = jnp.einsum("bsd,d->bs", xf, wa) + ba
    gate = jax.nn.sigmoid(jnp.einsum("bsd,d->bs", xf, wg) + bg)
    w = jax.nn.softmax(attn * gate, axis=1)[..., None]
    return jnp.sum(w * xf, axis=1)


if __name__ == "__main__":
    D = 32
    key = jax.random.PRNGKey(0)
    kwa, kba, kwg, kbg, kx = jax.random.split(key, 5)

    # nn.Linear(dim, 1) parameters: weight (1, dim), bias (1,).
    bound = 1.0 / (D ** 0.5)
    w_attn = jax.random.uniform(kwa, (1, D), jnp.float32, -bound, bound)
    b_attn = jax.random.uniform(kba, (1,), jnp.float32, -bound, bound)
    w_gate = jax.random.uniform(kwg, (1, D), jnp.float32, -bound, bound)
    b_gate = jax.random.uniform(kbg, (1,), jnp.float32, -bound, bound)

    def check(x, tb=None, atol=1e-5, rtol=1e-5, bf16_weights=False):
        out = jax.block_until_ready(
            gated_attn_pooling(x, w_attn, b_attn, w_gate, b_gate, tb=tb))
        if bf16_weights:   # the kernel rounds weights to x.dtype; mirror that
            wa = w_attn.astype(jnp.bfloat16).astype(jnp.float32)
            wg = w_gate.astype(jnp.bfloat16).astype(jnp.float32)
        else:
            wa, wg = w_attn, w_gate
        ref = reference(x, wa, b_attn, wg, b_gate)
        assert out.shape == (x.shape[0], D)
        assert out.dtype == x.dtype
        assert jnp.allclose(out.astype(jnp.float32), ref, atol=atol, rtol=rtol), \
            ("mismatch", x.shape, str(x.dtype), tb)

    kx1, kx2, kx3, kx4, kx5 = jax.random.split(kx, 5)

    # 1) f32, S % 8 == 0 -> fused MXU projection path, single grid step.
    check(jax.random.normal(kx1, (16, 8, D), jnp.float32))
    # 2) f32, forced tb=8 with B=20 -> 3 grid steps incl. a partial last block.
    check(jax.random.normal(kx2, (20, 8, D), jnp.float32), tb=8)
    # 3) f32, S=12 (not a multiple of 8) -> VPU fallback projection path.
    check(jax.random.normal(kx3, (16, 12, D), jnp.float32))
    # 4) bf16, S=16 (multiple of 16) -> MXU path with packed-sublane-legal merge.
    check(jax.random.normal(kx4, (16, 16, D), jnp.float32).astype(jnp.bfloat16),
          atol=2e-2, rtol=2e-2, bf16_weights=True)
    # 5) bf16, S=8 (not a multiple of 16) -> dtype-aware gate takes the fallback.
    check(jax.random.normal(kx5, (16, 8, D), jnp.float32).astype(jnp.bfloat16),
          atol=2e-2, rtol=2e-2, bf16_weights=True)

    print("KERNEL_OK")
</pallas_src>

<mosaic_0001>
module attributes {stable_mosaic.version = 11 : i64} {
  func.func @gated_attn_pool_kernel(%arg0: i32, %arg1: memref<16x8x32xf32, #tpu.memory_space<vmem>>, %arg2: memref<32x2xf32, #tpu.memory_space<vmem>>, %arg3: memref<1x2xf32, #tpu.memory_space<vmem>>, %arg4: memref<16x32xf32, #tpu.memory_space<vmem>>) attributes {dimension_semantics = [#tpu.dimension_semantics<parallel>], iteration_bounds = array<i64: 1>, scalar_prefetch = 0 : i64, scratch_operands = 0 : i64, tpu.core_type = #tpu.core_type<tc>, window_params = [{transform_indices = @transform_0, window_bounds = array<i64: 16, 8, 32>}, {pipeline_mode = #tpu.pipeline_mode<synchronous>, transform_indices = @transform_1, window_bounds = array<i64: 32, 2>}, {pipeline_mode = #tpu.pipeline_mode<synchronous>, transform_indices = @transform_2, window_bounds = array<i64: 1, 2>}, {transform_indices = @transform_3, window_bounds = array<i64: 16, 32>}]} {
    %c0 = arith.constant 0 : index
    %c0_0 = arith.constant 0 : index
    %c0_1 = arith.constant 0 : index
    %0 = vector.load %arg1[%c0, %c0_0, %c0_1] : memref<16x8x32xf32, #tpu.memory_space<vmem>>, vector<16x8x32xf32>
    %1 = vector.shape_cast %0 : vector<16x8x32xf32> to vector<128x32xf32>
    %c0_2 = arith.constant 0 : index
    %c0_3 = arith.constant 0 : index
    %2 = vector.load %arg2[%c0_2, %c0_3] : memref<32x2xf32, #tpu.memory_space<vmem>>, vector<32x2xf32>
    %cst = arith.constant dense<0.000000e+00> : vector<128x2xf32>
    %3 = tpu.matmul %1, %2, %cst {dimension_numbers = #tpu.dot_dimension_numbers<[1], [0], [0], [1], [0, 0, 1, 1], [], []>} : vector<128x32xf32>, vector<32x2xf32>, vector<128x2xf32> -> vector<128x2xf32>
    %c0_4 = arith.constant 0 : index
    %c0_5 = arith.constant 0 : index
    %4 = vector.load %arg3[%c0_4, %c0_5] : memref<1x2xf32, #tpu.memory_space<vmem>>, vector<1x2xf32>
    %5 = vector.broadcast %4 : vector<1x2xf32> to vector<128x2xf32>
    %6 = arith.addf %3, %5 : vector<128x2xf32>
    %7 = vector.shape_cast %6 : vector<128x2xf32> to vector<16x8x2xf32>
    %8 = vector.extract_strided_slice %7 {offsets = [0, 0, 0], sizes = [16, 8, 1], strides = [1, 1, 1]} : vector<16x8x2xf32> to vector<16x8x1xf32>
    %9 = vector.extract_strided_slice %7 {offsets = [0, 0, 1], sizes = [16, 8, 1], strides = [1, 1, 1]} : vector<16x8x2xf32> to vector<16x8x1xf32>
    %10 = arith.negf %9 : vector<16x8x1xf32>
    %11 = math.exp %10 : vector<16x8x1xf32>
    %cst_6 = arith.constant 1.000000e+00 : f32
    %12 = vector.broadcast %cst_6 : f32 to vector<16x8x1xf32>
    %13 = arith.addf %12, %11 : vector<16x8x1xf32>
    %14 = arith.divf %12, %13 : vector<16x8x1xf32>
    %15 = arith.mulf %8, %14 : vector<16x8x1xf32>
    %cst_7 = arith.constant dense<0xFF800000> : vector<16x1xf32>
    %16 = vector.multi_reduction <maximumf>, %15, %cst_7 [1] : vector<16x8x1xf32> to vector<16x1xf32>
    %17 = vector.shape_cast %16 : vector<16x1xf32> to vector<16x1x1xf32>
    %18 = vector.broadcast %17 : vector<16x1x1xf32> to vector<16x8x1xf32>
    %19 = arith.subf %15, %18 : vector<16x8x1xf32>
    %20 = math.exp %19 : vector<16x8x1xf32>
    %cst_8 = arith.constant dense<0.000000e+00> : vector<16x1xf32>
    %21 = vector.multi_reduction <add>, %20, %cst_8 [1] : vector<16x8x1xf32> to vector<16x1xf32>
    %22 = vector.broadcast %20 : vector<16x8x1xf32> to vector<16x8x32xf32>
    %23 = arith.mulf %22, %0 : vector<16x8x32xf32>
    %cst_9 = arith.constant dense<0.000000e+00> : vector<16x32xf32>
    %24 = vector.multi_reduction <add>, %23, %cst_9 [1] : vector<16x8x32xf32> to vector<16x32xf32>
    %25 = tpu.reciprocal %21 : vector<16x1xf32> -> vector<16x1xf32>
    %26 = vector.broadcast %25 : vector<16x1xf32> to vector<16x32xf32>
    %27 = arith.mulf %24, %26 : vector<16x32xf32>
    %c0_10 = arith.constant 0 : index
    %c0_11 = arith.constant 0 : index
    %28 = vector.load %arg4[%c0_10, %c0_11] : memref<16x32xf32, #tpu.memory_space<vmem>>, vector<16x32xf32>
    tpu.vector_store %arg4[%c0_10, %c0_11], %27 {strides = array<i32>} : memref<16x32xf32, #tpu.memory_space<vmem>>, vector<16x32xf32>,
    return
  }
  func.func @transform_0(%arg0: i32) -> (i32, i32, i32) {
    %c0_i32 = arith.constant 0 : i32
    %c0_i32_0 = arith.constant 0 : i32
    %c0_i32_1 = arith.constant 0 : i32
    return %arg0, %c0_i32, %c0_i32_0 : i32, i32, i32
  }
  func.func @transform_1(%arg0: i32) -> (i32, i32) {
    %c0_i32 = arith.constant 0 : i32
    %c0_i32_0 = arith.constant 0 : i32
    %c0_i32_1 = arith.constant 0 : i32
    return %c0_i32, %c0_i32_0 : i32, i32
  }
  func.func @transform_2(%arg0: i32) -> (i32, i32) {
    %c0_i32 = arith.constant 0 : i32
    %c0_i32_0 = arith.constant 0 : i32
    %c0_i32_1 = arith.constant 0 : i32
    return %c0_i32, %c0_i32_0 : i32, i32
  }
  func.func @transform_3(%arg0: i32) -> (i32, i32) {
    %c0_i32 = arith.constant 0 : i32
    %c0_i32_0 = arith.constant 0 : i32
    return %arg0, %c0_i32 : i32, i32
  }
}

</mosaic_0001>

<bundles_post_ra>
// kernel: tpu_custom_call.1
= control target key start
LH: loop header
LB: loop body
LE: loop exit
PB: predicated region body
PF: predicated region fallthrough
CT: control target
= control target key end

     0   :  { %8 = vsyncpa [#allocation3], 0  ;;  %s1710_s0 = inlined_call_operand.hbm [shape: f32[16,8,32], index: 0, kind: input, shape index: {}]   ;;  %s1711_s1 = inlined_call_operand.vmem [shape: f32[32,2], index: 1, kind: input, shape index: {}]   ;;  %s1712_s2 = inlined_call_operand.vmem [shape: f32[1,2], index: 2, kind: input, shape index: {}]   ;;  %s1713_s3 = inlined_call_operand.hbm [shape: f32[16,32], index: 3, kind: output, shape index: {}]  }
   0x1   :  { %9 = vsyncpa [#allocation4], 0  ;;  %s1374_s12 = smov [#allocation2]   ;;  %s1326_s16 = scalar_lea.hbm %s1710_s0, 2048 }
   0x2   :  { %s15_s13 = sshll.u32 %s1374_s12, 4  ;;  %p1327_p0 = scmp.ne.s32.totalorder %s1710_s0, %s1326_s16  ;;  %s16_s13 = int_to_ptr.vmem [resolvable:$true] %s15_s13 }
   0x3   :  { %p1330_p1 = scmp.lt.u32.totalorder %s1326_s16, %s1710_s0 }
   0x5   :  { %p1332_p2 = pnand %p1330_p1, %p1327_p0 }
   0x7   :  { %1335 = shalt.err (!%p1332_p2)
}
   0x8   :  { %s1336_s21 = scalar_lea.vmem %s16_s13, 2048  ;;  %p1341_p4 = scmp.lt.s32.totalorder %s16_s13, %s16_s13 }
   0x9   :  { %p1337_p3 = scmp.ne.s32.totalorder %s16_s13, %s1336_s21  ;;  %p1342_p5 = scmp.lt.s32.totalorder %s1336_s21, %s1336_s21 }
   0xb   :  { %p1343_p6 = por %p1342_p5, %p1341_p4 }
   0xd   :  { %p1344_p7 = pnand %p1343_p6, %p1337_p3 }
   0xf   :  { %1347 = shalt.err (!%p1344_p7)
}
  0x10   :  { %s1375_s22 = smov 128   ;;  %s1376_s23 = smov 8  }
  0x11   :  { %21 = dma.hbm_to_vmem [thread:$0]  %s1710_s0, 2048, %s16_s13, [#allocation3], %s1375_s22, %s1375_s22, %s1376_s23  }
  0x12   :  { %1370 = dma.done.wait [#allocation3], 2048  }
  0x13   :  { %1371 = vsyncadd [#allocation3], 4294965248  ;;  %vm56_vm0 = vcmask 261120   ;;  %v45_v0 = vld [vmem:[%s1711_s1] sm:$0xff]  ;;  %v46_v1 = vld [vmem:[%s1711_s1 + $0x8] sm:$0xff]  ;;  %vm426_vm1 = vcmask 7168  }
  0x14   :  { %v47_v2 = vld [vmem:[%s1711_s1 + $0x10] sm:$0xff]  ;;  %v1162_v3 = vpack.c.bf16 %v46_v1, %v45_v0  ;;  %v48_v4 = vld [vmem:[%s1711_s1 + $0x18] sm:$0xff]  ;;  %v29_v5 = vld [vmem:[#allocation2] sm:$0xff]  ;;  %vm1035_vm2 = vcmask 1041409   ;;  %vm1037_vm3 = vcmask 1042434   ;;  %vm1039_vm4 = vcmask 1043459  }
  0x15   :  { %v37_v6 = vld [vmem:[#allocation2 + $0x40] sm:$0xff]  ;;  %v1166_v7 = vpack.c.bf16 %v48_v4, %v47_v2  ;;  %1138 = vmatprep.mubr.msk.f32.mxu0 %vm56_vm0, %v29_v5  ;;  %v30_v8 = vld [vmem:[#allocation2 + $0x8] sm:$0xff]  ;;  %v31_v10 = vld [vmem:[#allocation2 + $0x10] sm:$0xff]  ;;  %vm1041_vm5 = vcmask 1044484   ;;  %vm1043_vm6 = vcmask 1045509   ;;  %vm1045_vm7 = vcmask 1046534  }
  0x16   :  { %1150 = vmatprep.mubr.msk.f32.mxu1 %vm56_vm0, %v37_v6  ;;  %1163 = vmatprep.subr.bf16.mxu0 %v1162_v3  ;;  %v38_v9 = vld [vmem:[#allocation2 + $0x48] sm:$0xff]  ;;  %v39_v11 = vld [vmem:[#allocation2 + $0x50] sm:$0xff]  ;;  %v32_v12 = vld [vmem:[#allocation2 + $0x18] sm:$0xff]  ;;  %vm1047_vm8 = vcmask 1047559   ;;  %s1379_s7 = smov [#allocation5]  }
  0x17   :  { %1170 = vmatprep.subr.bf16.mxu1 %v1162_v3  ;;  %1165 = vmatpush3.bf16.msra.mxu0 %v1162_v3  ;;  %v40_v13 = vld [vmem:[#allocation2 + $0x58] sm:$0xff]  ;;  %v33_v14 = vld [vmem:[#allocation2 + $0x20] sm:$0xff]  ;;  %v34_v16 = vld [vmem:[#allocation2 + $0x28] sm:$0xff]  ;;  %s1065_s8 = sshll.u32 %s1379_s7, 4  ;;  %s1066_s8 = int_to_ptr.vmem [resolvable:$true] %s1065_s8 }
  0x18   :  { %1172 = vmatpush3.bf16.msra.mxu1 %v1162_v3  ;;  %1167 = vmatprep.subr.bf16.mxu0 %v1166_v7  ;;  %v41_v15 = vld [vmem:[#allocation2 + $0x60] sm:$0xff]  ;;  %v42_v17 = vld [vmem:[#allocation2 + $0x68] sm:$0xff]  ;;  %v35_v18 = vld [vmem:[#allocation2 + $0x30] sm:$0xff]  ;;  %s1348_s9 = scalar_lea.vmem %s1066_s8, 256  ;;  %p1353_p9 = scmp.lt.s32.totalorder %s1066_s8, %s1066_s8 }
  0x19   :  { %1171 = vmatprep.subr.bf16.mxu1 %v1166_v7  ;;  %v43_v19 = vld [vmem:[#allocation2 + $0x70] sm:$0xff]  ;;  %v36_v20 = vld [vmem:[#allocation2 + $0x38] sm:$0xff]  ;;  %v1446_v22 = vld [vmem:[%s1712_s2] ss:$0 sm:$0xff]  ;;  %s1377_s2 = smov 127   ;;  %p1349_p8 = scmp.ne.s32.totalorder %s1066_s8, %s1348_s9 }
  0x1a   :  { %v44_v21 = vld [vmem:[#allocation2 + $0x78] sm:$0xff]  ;;  %p1354_p10 = scmp.lt.s32.totalorder %s1348_s9, %s1348_s9 }
  0x1b   :  { %1169 = vmatpush3.bf16.msra.mxu0 %v1166_v7 }
  0x1c   :  { %1173 = vmatpush3.bf16.msra.mxu1 %v1166_v7  ;;  %p1355_p11 = por %p1354_p10, %p1353_p9 }
  0x1e   :  { %1139 = vmatmul.mubr.msk.f32.vlgmr.msra.gmra.mrb[0].mxu0 %vm56_vm0, %v30_v8  ;;  %p1356_p12 = pnand %p1355_p11, %p1349_p8 }
  0x1f   :  { %1151 = vmatmul.mubr.msk.f32.vlgmr.msra.gmra.mrb[0].mxu1 %vm56_vm0, %v38_v9  ;;  %1141 = vmatprep.mubr.msk.f32.mxu0 %vm56_vm0, %v31_v10 }
  0x20   :  { %1153 = vmatprep.mubr.msk.f32.mxu1 %vm56_vm0, %v39_v11 }
  0x22   :  { %1142 = vmatmul.mubr.msk.f32.gmra.mrb[2].mxu0 %vm56_vm0, %v32_v12 }
  0x23   :  { %1154 = vmatmul.mubr.msk.f32.gmra.mrb[2].mxu1 %vm56_vm0, %v40_v13  ;;  %1144 = vmatprep.mubr.msk.f32.mxu0 %vm56_vm0, %v33_v14 }
  0x24   :  { %1156 = vmatprep.mubr.msk.f32.mxu1 %vm56_vm0, %v41_v15 }
  0x26   :  { %1145 = vmatmul.mubr.msk.f32.gmra.mrb[4].mxu0 %vm56_vm0, %v34_v16 }
  0x27   :  { %1157 = vmatmul.mubr.msk.f32.gmra.mrb[4].mxu1 %vm56_vm0, %v42_v17  ;;  %1147 = vmatprep.mubr.msk.f32.mxu0 %vm56_vm0, %v35_v18 }
  0x28   :  { %1159 = vmatprep.mubr.msk.f32.mxu1 %vm56_vm0, %v43_v19 }
  0x2a   :  { %1148 = vmatmul.mubr.msk.f32.gmra.mrb[6].mxu0 %vm56_vm0, %v36_v20 }
  0x2b   :  { %1160 = vmatmul.mubr.msk.f32.gmra.mrb[6].mxu1 %vm56_vm0, %v44_v21 }
  0xf1   :  { %v1140_v23 = vpop.f32.mrb[0].mxu0 }
  0xf2   :  { %v1152_v24 = vpop.f32.mrb[0].mxu1  ;;  %v1449_v25 = vadd.f32 %v1140_v23, %v1446_v22  ;;  %v171_v27 = vpop.f32.mrb[1].mxu0 }
  0xf3   :  { %v1452_v26 = vadd.f32 %v1152_v24, %v1446_v22  ;;  %v211_v28 = vpop.f32.mrb[1].mxu1  ;;  %v1455_v29 = vadd.f32 %v1446_v22, %v171_v27 }
  0xf4   :  { %v1458_v30 = vadd.f32 %v1446_v22, %v211_v28  ;;  %v1095_v31 = vmul.f32 -1.442695, %v1449_v25 }
  0xf5   :  { %v1103_v32 = vmul.f32 -1.442695, %v1452_v26  ;;  %v1094_v33 = vmul.f32 -1.442695, %v1455_v29  ;;  %v1143_v35 = vpop.f32.mrb[2].mxu0 }
  0xf6   :  { %v1102_v34 = vmul.f32 -1.442695, %v1458_v30  ;;  %v1155_v36 = vpop.f32.mrb[2].mxu1  ;;  %1182 = vpow2.f32 %v1095_v31  ;;  %v1465_v37 = vadd.f32 %v1143_v35, %v1446_v22  ;;  %v181_v38 = vpop.f32.mrb[3].mxu0 }
  0xf7   :  { %v1468_v39 = vadd.f32 %v1155_v36, %v1446_v22  ;;  %v221_v40 = vpop.f32.mrb[3].mxu1  ;;  %1184 = vpow2.f32 %v1103_v32  ;;  %v1471_v41 = vadd.f32 %v1446_v22, %v181_v38 }
  0xf8   :  { %v1474_v42 = vadd.f32 %v1446_v22, %v221_v40  ;;  %1186 = vpow2.f32 %v1094_v33  ;;  %v1097_v43 = vmul.f32 -1.442695, %v1465_v37 }
  0xf9   :  { %v1105_v44 = vmul.f32 -1.442695, %v1468_v39  ;;  %1188 = vpow2.f32 %v1102_v34  ;;  %v1096_v45 = vmul.f32 -1.442695, %v1471_v41  ;;  %v1146_v47 = vpop.f32.mrb[4].mxu0 }
  0xfa   :  { %v1104_v46 = vmul.f32 -1.442695, %v1474_v42  ;;  %v1158_v48 = vpop.f32.mrb[4].mxu1  ;;  %1190 = vpow2.f32 %v1097_v43  ;;  %v1481_v49 = vadd.f32 %v1146_v47, %v1446_v22  ;;  %v191_v50 = vpop.f32.mrb[5].mxu0 }
  0xfb   :  { %v1484_v51 = vadd.f32 %v1158_v48, %v1446_v22  ;;  %v231_v52 = vpop.f32.mrb[5].mxu1  ;;  %1192 = vpow2.f32 %v1096_v45  ;;  %v1487_v53 = vadd.f32 %v1446_v22, %v191_v50 }
  0xfc   :  { %1194 = vpow2.f32 %v1105_v44  ;;  %v1099_v54 = vmul.f32 -1.442695, %v1481_v49  ;;  %v1492_v56 = vadd.f32 %v1446_v22, %v231_v52 }
  0xfd   :  { %v1107_v55 = vmul.f32 -1.442695, %v1484_v51  ;;  %1196 = vpow2.f32 %v1104_v46  ;;  %v1149_v57 = vpop.f32.mrb[6].mxu0  ;;  %v1098_v59 = vmul.f32 -1.442695, %v1487_v53 }
  0xfe   :  { %v1161_v58 = vpop.f32.mrb[6].mxu1  ;;  %1198 = vpow2.f32 %v1099_v54  ;;  %v201_v60 = vpop.f32.mrb[7].mxu0  ;;  %v1106_v1 = vmul.f32 -1.442695, %v1492_v56  ;;  %v1497_v6 = vadd.f32 %v1149_v57, %v1446_v22 }
  0xff   :  { %v241_v61 = vpop.f32.mrb[7].mxu1  ;;  %1200 = vpow2.f32 %v1107_v55  ;;  %v1501_v17 = vadd.f32 %v1446_v22, %v201_v60  ;;  %v1504_v19 = vadd.f32 %v1161_v58, %v1446_v22 }
 0x100   :  { %v1183_v62 = vpop.eup %1182  ;;  %1202 = vpow2.f32 %v1098_v59  ;;  %v1101_v14 = vmul.f32 -1.442695, %v1497_v6  ;;  %v1507_v23 = vadd.f32 %v1446_v22, %v241_v61 }
 0x101   :  { %v1185_v63 = vpop.eup %1184  ;;  %v299_v0 = vadd.f32 1.0, %v1183_v62  ;;  %v1100_v28 = vmul.f32 -1.442695, %v1501_v17  ;;  %v1109_v32 = vmul.f32 -1.442695, %v1504_v19 }
 0x102   :  { %v1187_v2 = vpop.eup %1186  ;;  %v307_v3 = vadd.f32 1.0, %v1185_v63  ;;  %v1108_v34 = vmul.f32 -1.442695, %v1507_v23 }
 0x103   :  { %v1189_v4 = vpop.eup %1188  ;;  %1204 = vrcp.f32 %v299_v0  ;;  %v298_v5 = vadd.f32 1.0, %v1187_v2 }
 0x104   :  { %v1191_v7 = vpop.eup %1190  ;;  %1206 = vrcp.f32 %v307_v3  ;;  %v306_v8 = vadd.f32 1.0, %v1189_v4  ;;  %v1378_v3 = vmov 0  }
 0x105   :  { %v1193_v9 = vpop.eup %1192  ;;  %v301_v10 = vadd.f32 1.0, %v1191_v7  ;;  %1208 = vpow2.f32 %v1106_v1  ;;  %1181 = vset.pattern.permute.xlu0 %v1378_v3  ;;  %1180 = vset.pattern.permute.xlu1 %v1378_v3 }
 0x106   :  { %v1195_v11 = vpop.eup %1194  ;;  %1210 = vrcp.f32 %v306_v8  ;;  %v300_v16 = vadd.f32 1.0, %v1193_v9 }
 0x107   :  { %v1197_v12 = vpop.eup %1196  ;;  %1212 = vrcp.f32 %v298_v5  ;;  %v309_v13 = vadd.f32 1.0, %v1195_v11 }
 0x108   :  { %v1199_v15 = vpop.eup %1198  ;;  %1214 = vrcp.f32 %v301_v10  ;;  %v308_v18 = vadd.f32 1.0, %v1197_v12 }
 0x109   :  { %v1201_v20 = vpop.eup %1200  ;;  %1216 = vrcp.f32 %v309_v13  ;;  %v303_v21 = vadd.f32 1.0, %v1199_v15 }
 0x10a   :  { %v311_v24 = vadd.f32 1.0, %v1201_v20  ;;  %1218 = vpow2.f32 %v1101_v14  ;;  %v1203_v27 = vpop.eup %1202 }
 0x10b   :  { %1220 = vrcp.f32 %v300_v16  ;;  %v302_v43 = vadd.f32 1.0, %v1203_v27 }
 0x10c   :  { %1222 = vrcp.f32 %v308_v18 }
 0x10d   :  { %v1205_v31 = vpop.eup %1204  ;;  %1224 = vrcp.f32 %v303_v21 }
 0x10e   :  { %v1207_v33 = vpop.eup %1206  ;;  %364 = vrot.lane.b32.xlu0 %v1205_v31, %s1377_s2  ;;  %1226 = vrcp.f32 %v311_v24 }
 0x10f   :  { %v1209_v35 = vpop.eup %1208  ;;  %380 = vrot.lane.b32.xlu1 %v1207_v33, %s1377_s2  ;;  %1228 = vpow2.f32 %v1100_v28 }
 0x110   :  { %v1211_v22 = vpop.eup %1210  ;;  %1230 = vpow2.f32 %v1109_v32  ;;  %v310_v38 = vadd.f32 1.0, %v1209_v35 }
 0x111   :  { %v1213_v36 = vpop.eup %1212  ;;  %1232 = vpow2.f32 %v1108_v34 }
 0x112   :  { %362 = vrot.lane.b32.xlu0 %v1213_v36, %s1377_s2  ;;  %v1215_v40 = vpop.eup %1214  ;;  %1234 = vrcp.f32 %v310_v38 }
 0x113   :  { %378 = vrot.lane.b32.xlu1 %v1211_v22, %s1377_s2  ;;  %v1217_v44 = vpop.eup %1216  ;;  %1236 = vrcp.f32 %v302_v43 }
 0x114   :  { %v1219_v45 = vpop.eup %1218 }
 0x115   :  { %v1221_v46 = vpop.eup %1220  ;;  %v305_v58 = vadd.f32 1.0, %v1219_v45 }
 0x116   :  { %368 = vrot.lane.b32.xlu0 %v1215_v40, %s1377_s2  ;;  %v1223_v47 = vpop.eup %1222 }
 0x117   :  { %384 = vrot.lane.b32.xlu1 %v1217_v44, %s1377_s2  ;;  %v1225_v48 = vpop.eup %1224 }
 0x118   :  { %v1227_v50 = vpop.eup %1226 }
 0x119   :  { %v1229_v52 = vpop.eup %1228 }
 0x11a   :  { %366 = vrot.lane.b32.xlu0 %v1221_v46, %s1377_s2  ;;  %v1231_v54 = vpop.eup %1230  ;;  %v304_v55 = vadd.f32 1.0, %v1229_v52 }
 0x11b   :  { %382 = vrot.lane.b32.xlu1 %v1223_v47, %s1377_s2  ;;  %v1233_v57 = vpop.eup %1232  ;;  %v313_v59 = vadd.f32 1.0, %v1231_v54 }
 0x11c   :  { %1238 = vrcp.f32 %v304_v55  ;;  %v312_v60 = vadd.f32 1.0, %v1233_v57  ;;  %v1235_v61 = vpop.eup %1234 }
 0x11d   :  { %v1237_v62 = vpop.eup %1236 }
 0x11e   :  { %372 = vrot.lane.b32.xlu0 %v1225_v48, %s1377_s2  ;;  %1240 = vrcp.f32 %v312_v60 }
 0x11f   :  { %388 = vrot.lane.b32.xlu1 %v1227_v50, %s1377_s2  ;;  %1242 = vrcp.f32 %v305_v58 }
 0x120   :  { %1244 = vrcp.f32 %v313_v59 }
 0x122   :  { %370 = vrot.lane.b32.xlu0 %v1237_v62, %s1377_s2 }
 0x123   :  { %386 = vrot.lane.b32.xlu1 %v1235_v61, %s1377_s2 }
 0x126   :  { %v1239_v63 = vpop.eup %1238 }
 0x127   :  { %374 = vrot.lane.b32.xlu0 %v1239_v63, %s1377_s2 }
 0x128   :  { %v1241_v0 = vpop.eup %1240 }
 0x129   :  { %v1243_v1 = vpop.eup %1242  ;;  %390 = vrot.lane.b32.xlu1 %v1241_v0, %s1377_s2 }
 0x12a   :  { %v1245_v2 = vpop.eup %1244 }
 0x12b   :  { %376 = vrot.lane.b32.xlu0 %v1243_v1, %s1377_s2 }
 0x12d   :  { %392 = vrot.lane.b32.xlu1 %v1245_v2, %s1377_s2 }
 0x180   :  { %v365_v4 = vpop.permute.xlu0 %364 }
 0x181   :  { %v381_v5 = vpop.permute.xlu1 %380  ;;  %v411_v7 = vmul.f32 %v365_v4, %v1449_v25 }
 0x182   :  { %v419_v8 = vmul.f32 %v381_v5, %v1452_v26 }
 0x183   :  { %v434_v9 = vsel %vm426_vm1, %v411_v7, -inf }
 0x184   :  { %v490_v10 = vsel %vm426_vm1, %v419_v8, -inf  ;;  %v435_v11 = vrot.slane %v434_v9, 4  ;;  %v363_v12 = vpop.permute.xlu0 %362 }
 0x185   :  { %v491_v13 = vrot.slane %v490_v10, 4  ;;  %v379_v14 = vpop.permute.xlu1 %378  ;;  %v1533_v15 = vmul.f32 %v363_v12, %v1455_v29 }
 0x186   :  { %v436_v16 = vmax.f32 %v434_v9, %v435_v11  ;;  %v1536_v18 = vmul.f32 %v379_v14, %v1458_v30 }
 0x187   :  { %v492_v20 = vmax.f32 %v490_v10, %v491_v13  ;;  %v427_v25 = vsel %vm426_vm1, %v1533_v15, -inf }
 0x188   :  { %v437_v26 = vrot.slane %v436_v16, 2  ;;  %v483_v21 = vsel %vm426_vm1, %v1536_v18, -inf  ;;  %v428_v24 = vrot.slane %v427_v25, 4  ;;  %v369_v27 = vpop.permute.xlu0 %368 }
 0x189   :  { %v493_v28 = vrot.slane %v492_v20, 2  ;;  %v484_v31 = vrot.slane %v483_v21, 4  ;;  %v385_v32 = vpop.permute.xlu1 %384  ;;  %v1543_v29 = vmul.f32 %v369_v27, %v1465_v37 }
 0x18a   :  { %v438_v33 = vmax.f32 %v436_v16, %v437_v26  ;;  %v429_v34 = vmax.f32 %v427_v25, %v428_v24  ;;  %v1546_v30 = vmul.f32 %v385_v32, %v1468_v39 }
 0x18b   :  { %v494_v35 = vmax.f32 %v492_v20, %v493_v28  ;;  %v485_v22 = vmax.f32 %v483_v21, %v484_v31  ;;  %v448_v36 = vsel %vm426_vm1, %v1543_v29, -inf }
 0x18c   :  { %v439_v38 = vrot.slane %v438_v33, 1  ;;  %v430_v40 = vrot.slane %v429_v34, 2  ;;  %v504_v43 = vsel %vm426_vm1, %v1546_v30, -inf  ;;  %v449_v44 = vrot.slane %v448_v36, 4  ;;  %v367_v45 = vpop.permute.xlu0 %366 }
 0x18d   :  { %v495_v46 = vrot.slane %v494_v35, 1  ;;  %v486_v37 = vrot.slane %v485_v22, 2  ;;  %v505_v47 = vrot.slane %v504_v43, 4  ;;  %v383_v48 = vpop.permute.xlu1 %382  ;;  %v1553_v50 = vmul.f32 %v367_v45, %v1471_v41 }
 0x18e   :  { %v440_v39 = vmax.f32 %v438_v33, %v439_v38  ;;  %v431_v52 = vmax.f32 %v429_v34, %v430_v40  ;;  %v450_v54 = vmax.f32 %v448_v36, %v449_v44  ;;  %v1556_v55 = vmul.f32 %v383_v48, %v1474_v42 }
 0x18f   :  { %v496_v57 = vmax.f32 %v494_v35, %v495_v46  ;;  %v487_v58 = vmax.f32 %v485_v22, %v486_v37  ;;  %v506_v59 = vmax.f32 %v504_v43, %v505_v47  ;;  %v441_v60 = vsel %vm426_vm1, %v1553_v50, -inf }
 0x190   :  { %v540_v61 = vsub.f32 %v411_v7, %v440_v39  ;;  %v432_v62 = vrot.slane %v431_v52, 1  ;;  %v451_v63 = vrot.slane %v450_v54, 2  ;;  %v497_v0 = vsel %vm426_vm1, %v1556_v55, -inf  ;;  %v373_v25 = vpop.permute.xlu0 %372 }
 0x191   :  { %v548_v41 = vsub.f32 %v419_v8, %v496_v57  ;;  %v488_v1 = vrot.slane %v487_v58, 1  ;;  %v507_v2 = vrot.slane %v506_v59, 2  ;;  %v498_v3 = vrot.slane %v497_v0, 4  ;;  %v389_v4 = vpop.permute.xlu1 %388 }
 0x192   :  { %v557_v5 = vmul.f32 1.442695, %v540_v61  ;;  %v433_v42 = vmax.f32 %v431_v52, %v432_v62  ;;  %v452_v9 = vmax.f32 %v450_v54, %v451_v63  ;;  %v442_v10 = vrot.slane %v441_v60, 4 }
 0x193   :  { %v573_v11 = vmul.f32 1.442695, %v548_v41  ;;  %v489_v12 = vmax.f32 %v487_v58, %v488_v1  ;;  %v508_v13 = vmax.f32 %v506_v59, %v507_v2  ;;  %v499_v14 = vmax.f32 %v497_v0, %v498_v3 }
 0x194   :  { %1246 = vpow2.f32 %v557_v5  ;;  %v539_v7 = vsub.f32 %v1533_v15, %v433_v42  ;;  %v453_v16 = vrot.slane %v452_v9, 1  ;;  %v443_v20 = vmax.f32 %v441_v60, %v442_v10  ;;  %v371_v59 = vpop.permute.xlu0 %370 }
 0x195   :  { %1248 = vpow2.f32 %v573_v11  ;;  %v547_v8 = vsub.f32 %v1536_v18, %v489_v12  ;;  %v509_v26 = vrot.slane %v508_v13, 1  ;;  %v500_v21 = vrot.slane %v499_v14, 2  ;;  %v387_v15 = vpop.permute.xlu1 %386 }
 0x196   :  { %v555_v24 = vmul.f32 1.442695, %v539_v7  ;;  %v454_v27 = vmax.f32 %v452_v9, %v453_v16  ;;  %v444_v28 = vrot.slane %v443_v20, 2  ;;  %v1565_v31 = vmul.f32 %v389_v4, %v1484_v51 }
 0x197   :  { %v571_v32 = vmul.f32 1.442695, %v547_v8  ;;  %v510_v33 = vmax.f32 %v508_v13, %v509_v26  ;;  %v501_v34 = vmax.f32 %v499_v14, %v500_v21  ;;  %v1568_v35 = vmul.f32 %v373_v25, %v1481_v49 }
 0x198   :  { %1250 = vpow2.f32 %v555_v24  ;;  %v542_v22 = vsub.f32 %v1543_v29, %v454_v27  ;;  %v445_v36 = vmax.f32 %v443_v20, %v444_v28  ;;  %v518_v18 = vsel %vm426_vm1, %v1565_v31, -inf }
 0x199   :  { %1252 = vpow2.f32 %v571_v32  ;;  %v550_v38 = vsub.f32 %v1546_v30, %v510_v33  ;;  %v502_v40 = vrot.slane %v501_v34, 1  ;;  %v519_v51 = vrot.slane %v518_v18, 4  ;;  %v375_v24 = vpop.permute.xlu0 %374 }
 0x19a   :  { %v561_v43 = vmul.f32 1.442695, %v542_v22  ;;  %v446_v44 = vrot.slane %v445_v36, 1  ;;  %v462_v45 = vsel %vm426_vm1, %v1568_v35, -inf  ;;  %v1577_v49 = vmul.f32 %v387_v15, %v1492_v56 }
 0x19b   :  { %v503_v46 = vmax.f32 %v501_v34, %v502_v40  ;;  %v520_v37 = vmax.f32 %v518_v18, %v519_v51  ;;  %v463_v29 = vrot.slane %v462_v45, 4  ;;  %v577_v39 = vmul.f32 1.442695, %v550_v38  ;;  %v391_v20 = vpop.permute.xlu1 %390 }
 0x19c   :  { %1254 = vpow2.f32 %v561_v43  ;;  %v447_v47 = vmax.f32 %v445_v36, %v446_v44  ;;  %v511_v48 = vsel %vm426_vm1, %v1577_v49, -inf  ;;  %v1584_v0 = vmul.f32 %v371_v59, %v1487_v53 }
 0x19d   :  { %v464_v30 = vmax.f32 %v462_v45, %v463_v29  ;;  %v549_v54 = vsub.f32 %v1556_v55, %v503_v46  ;;  %v521_v58 = vrot.slane %v520_v37, 2  ;;  %v512_v61 = vrot.slane %v511_v48, 4  ;;  %v377_v40 = vpop.permute.xlu0 %376 }
 0x19e   :  { %v1247_v52 = vpop.eup %1246  ;;  %v541_v57 = vsub.f32 %v1553_v50, %v447_v47  ;;  %1256 = vpow2.f32 %v577_v39  ;;  %v455_v4 = vsel %vm426_vm1, %v1584_v0, -inf  ;;  %v1600_v21 = vmul.f32 %v391_v20, %v1507_v23 }
 0x19f   :  { %v1249_v60 = vpop.eup %1248  ;;  %v465_v56 = vrot.slane %v464_v30, 2  ;;  %706 = vperm.xlu1 %1180, %v1247_v52   ;;  %v575_v1 = vmul.f32 1.442695, %v549_v54  ;;  %v522_v2 = vmax.f32 %v520_v37, %v521_v58  ;;  %v513_v50 = vmax.f32 %v511_v48, %v512_v61  ;;  %v393_v36 = vpop.permute.xlu1 %392 }
 0x1a0   :  { %v559_v62 = vmul.f32 1.442695, %v541_v57  ;;  %746 = vperm.xlu0 %1181, %v1249_v60   ;;  %v456_v53 = vrot.slane %v455_v4, 4  ;;  %v650_v23 = vsel %vm426_vm1, %v1249_v60, 0.0  ;;  %v594_v18 = vsel %vm426_vm1, %v1247_v52, 0.0 }
 0x1a1   :  { %v466_v63 = vmax.f32 %v464_v30, %v465_v56  ;;  %v523_v42 = vrot.slane %v522_v2, 1  ;;  %v514_v10 = vrot.slane %v513_v50, 2  ;;  %v1612_v44 = vmul.f32 %v375_v24, %v1501_v17 }
 0x1a2   :  { %v1251_v41 = vpop.eup %1250  ;;  %1258 = vpow2.f32 %v559_v62  ;;  %v457_v16 = vmax.f32 %v455_v4, %v456_v53  ;;  %v1616_v37 = vmul.f32 %v393_v36, %v1504_v19  ;;  %v1622_v39 = vmul.f32 %v377_v40, %v1497_v6 }
 0x1a3   :  { %v1253_v55 = vpop.eup %1252  ;;  %v467_v3 = vrot.slane %v466_v63, 1  ;;  %1260 = vpow2.f32 %v575_v1  ;;  %v524_v11 = vmax.f32 %v522_v2, %v523_v42  ;;  %v515_v14 = vmax.f32 %v513_v50, %v514_v10 }
 0x1a4   :  { %741 = vperm.xlu1 %1180, %v1253_v55   ;;  %701 = vperm.xlu0 %1181, %v1251_v41   ;;  %v458_v28 = vrot.slane %v457_v16, 2  ;;  %v643_v38 = vsel %vm426_vm1, %v1253_v55, 0.0  ;;  %v469_v48 = vsel %vm426_vm1, %v1612_v44, -inf  ;;  %v651_v30 = vrot.slane %v650_v23, 4 }
 0x1a5   :  { %v468_v9 = vmax.f32 %v466_v63, %v467_v3  ;;  %v552_v25 = vsub.f32 %v1565_v31, %v524_v11  ;;  %v516_v26 = vrot.slane %v515_v14, 1  ;;  %v587_v31 = vsel %vm426_vm1, %v1251_v41, 0.0 }
 0x1a6   :  { %v1588_v5 = vpop.eup %1254  ;;  %v459_v33 = vmax.f32 %v457_v16, %v458_v28  ;;  %v588_v45 = vrot.slane %v587_v31, 4  ;;  %v595_v52 = vrot.slane %v594_v18, 4  ;;  %v644_v54 = vrot.slane %v643_v38, 4 }
 0x1a7   :  { %v544_v12 = vsub.f32 %v1568_v35, %v468_v9  ;;  %v581_v32 = vmul.f32 1.442695, %v552_v25  ;;  %v517_v34 = vmax.f32 %v515_v14, %v516_v26  ;;  %v525_v35 = vsel %vm426_vm1, %v1600_v21, -inf }
 0x1a8   :  { %716 = vperm.xlu0 %1181, %v1588_v5   ;;  %v1592_v13 = vpop.eup %1256  ;;  %v460_v15 = vrot.slane %v459_v33, 1  ;;  %v526_v22 = vrot.slane %v525_v35, 4  ;;  %v470_v17 = vrot.slane %v469_v48, 4  ;;  %v476_v19 = vsel %vm426_vm1, %v1622_v39, -inf }
 0x1a9   :  { %v565_v8 = vmul.f32 1.442695, %v544_v12  ;;  %v551_v46 = vsub.f32 %v1577_v49, %v517_v34  ;;  %v532_v49 = vsel %vm426_vm1, %v1616_v37, -inf  ;;  %v589_v59 = vadd.f32 %v588_v45, %v587_v31 }
 0x1aa   :  { %v461_v51 = vmax.f32 %v459_v33, %v460_v15  ;;  %v527_v43 = vmax.f32 %v525_v35, %v526_v22  ;;  %v471_v60 = vmax.f32 %v469_v48, %v470_v17  ;;  %v533_v56 = vrot.slane %v532_v49, 4 }
 0x1ab   :  { %1262 = vpow2.f32 %v565_v8  ;;  %v579_v62 = vmul.f32 1.442695, %v551_v46  ;;  %v477_v63 = vrot.slane %v476_v19, 4  ;;  %v596_v41 = vadd.f32 %v595_v52, %v594_v18 }
 0x1ac   :  { %v1594_v7 = vpop.eup %1258  ;;  %756 = vperm.xlu0 %1181, %v1592_v13   ;;  %1264 = vpow2.f32 %v581_v32  ;;  %v543_v29 = vsub.f32 %v1584_v0, %v461_v51  ;;  %v528_v47 = vrot.slane %v527_v43, 2  ;;  %v652_v0 = vadd.f32 %v651_v30, %v650_v23 }
 0x1ad   :  { %711 = vperm.xlu1 %1180, %v1594_v7   ;;  %v1602_v27 = vpop.eup %1260  ;;  %v472_v1 = vrot.slane %v471_v60, 2  ;;  %v534_v2 = vmax.f32 %v532_v49, %v533_v56  ;;  %v645_v55 = vadd.f32 %v644_v54, %v643_v38  ;;  %v608_v3 = vsel %vm426_vm1, %v1588_v5, 0.0 }
 0x1ae   :  { %v563_v57 = vmul.f32 1.442695, %v543_v29  ;;  %v529_v58 = vmax.f32 %v527_v43, %v528_v47  ;;  %v478_v4 = vmax.f32 %v476_v19, %v477_v63  ;;  %v590_v42 = vrot.slane %v589_v59, 2 }
 0x1af   :  { %v664_v9 = vsel %vm426_vm1, %v1592_v13, 0.0  ;;  %v473_v10 = vmax.f32 %v471_v60, %v472_v1  ;;  %v535_v53 = vrot.slane %v534_v2, 2  ;;  %v601_v12 = vsel %vm426_vm1, %v1594_v7, 0.0 }
 0x1b0   :  { %1266 = vpow2.f32 %v563_v57  ;;  %v530_v6 = vrot.slane %v529_v58, 1  ;;  %v479_v16 = vrot.slane %v478_v4, 2  ;;  %v597_v20 = vrot.slane %v596_v41, 2 }
 0x1b1   :  { %751 = vperm.xlu1 %1180, %v1602_v27   ;;  %1268 = vpow2.f32 %v579_v62  ;;  %v609_v25 = vrot.slane %v608_v3, 4  ;;  %v474_v8 = vrot.slane %v473_v10, 1  ;;  %v536_v5 = vmax.f32 %v534_v2, %v535_v53 }
 0x1b2   :  { %v531_v50 = vmax.f32 %v529_v58, %v530_v6  ;;  %v653_v26 = vrot.slane %v652_v0, 2  ;;  %v665_v24 = vrot.slane %v664_v9, 4  ;;  %v480_v32 = vmax.f32 %v478_v4, %v479_v16 }
 0x1b3   :  { %v657_v13 = vsel %vm426_vm1, %v1602_v27, 0.0  ;;  %v602_v33 = vrot.slane %v601_v12, 4  ;;  %v475_v34 = vmax.f32 %v473_v10, %v474_v8  ;;  %v537_v35 = vrot.slane %v536_v5, 1 }
 0x1b4   :  { %v553_v14 = vsub.f32 %v1600_v21, %v531_v50  ;;  %v646_v7 = vrot.slane %v645_v55, 2  ;;  %v591_v31 = vadd.f32 %v590_v42, %v589_v59  ;;  %v481_v21 = vrot.slane %v480_v32, 1 }
 0x1b5   :  { %v1263_v61 = vpop.eup %1262  ;;  %v598_v15 = vadd.f32 %v597_v20, %v596_v41  ;;  %v610_v22 = vadd.f32 %v609_v25, %v608_v3  ;;  %v545_v36 = vsub.f32 %v1612_v44, %v475_v34  ;;  %v538_v23 = vmax.f32 %v536_v5, %v537_v35 }
 0x1b6   :  { %726 = vperm.xlu0 %1181, %v1263_v61   ;;  %v1265_v11 = vpop.eup %1264  ;;  %v583_v28 = vmul.f32 1.442695, %v553_v14  ;;  %v666_v38 = vadd.f32 %v665_v24, %v664_v9  ;;  %v658_v40 = vrot.slane %v657_v13, 4  ;;  %v622_v51 = vsel %vm426_vm1, %v1263_v61, 0.0 }
 0x1b7   :  { %v482_v43 = vmax.f32 %v480_v32, %v481_v21  ;;  %v654_v45 = vadd.f32 %v653_v26, %v652_v0  ;;  %v603_v27 = vadd.f32 %v602_v33, %v601_v12  ;;  %v567_v46 = vmul.f32 1.442695, %v545_v36 }
 0x1b8   :  { %1270 = vpow2.f32 %v583_v28  ;;  %v554_v29 = vsub.f32 %v1616_v37, %v538_v23  ;;  %v647_v47 = vadd.f32 %v646_v7, %v645_v55  ;;  %v592_v48 = vrot.slane %v591_v31, 1 }
 0x1b9   :  { %v678_v30 = vsel %vm426_vm1, %v1265_v11, 0.0  ;;  %v546_v52 = vsub.f32 %v1622_v39, %v482_v43  ;;  %v611_v44 = vrot.slane %v610_v22, 2  ;;  %v623_v54 = vrot.slane %v622_v51, 4 }
 0x1ba   :  { %766 = vperm.xlu0 %1181, %v1265_v11   ;;  %v1267_v18 = vpop.eup %1266  ;;  %1272 = vpow2.f32 %v567_v46  ;;  %v585_v17 = vmul.f32 1.442695, %v554_v29  ;;  %v667_v58 = vrot.slane %v666_v38, 2  ;;  %v659_v49 = vadd.f32 %v658_v40, %v657_v13 }
 0x1bb   :  { %721 = vperm.xlu1 %1180, %v1267_v18   ;;  %v1269_v57 = vpop.eup %1268  ;;  %v615_v19 = vsel %vm426_vm1, %v1267_v18, 0.0  ;;  %v569_v59 = vmul.f32 1.442695, %v546_v52  ;;  %v599_v60 = vrot.slane %v598_v15, 1  ;;  %v604_v56 = vrot.slane %v603_v27, 2 }
 0x1bc   :  { %v679_v37 = vrot.slane %v678_v30, 4  ;;  %1274 = vpow2.f32 %v585_v17  ;;  %v648_v61 = vrot.slane %v647_v47, 1  ;;  %v593_v62 = vadd.f32 %v592_v48, %v591_v31 }
 0x1bd   :  { %1276 = vpow2.f32 %v569_v59  ;;  %v612_v6 = vadd.f32 %v611_v44, %v610_v22  ;;  %v624_v39 = vadd.f32 %v623_v54, %v622_v51  ;;  %v671_v63 = vsel %vm426_vm1, %v1269_v57, 0.0 }
 0x1be   :  { %v616_v0 = vrot.slane %v615_v19, 4  ;;  %v655_v1 = vrot.slane %v654_v45, 1  ;;  %v668_v2 = vadd.f32 %v667_v58, %v666_v38  ;;  %v660_v55 = vrot.slane %v659_v49, 2 }
 0x1bf   :  { %761 = vperm.xlu1 %1180, %v1269_v57   ;;  %v600_v3 = vadd.f32 %v599_v60, %v598_v15  ;;  %v605_v50 = vadd.f32 %v604_v56, %v603_v27  ;;  %v680_v4 = vadd.f32 %v679_v37, %v678_v30  ;;  %v649_v42 = vadd.f32 %v648_v61, %v647_v47 }
 0x1c0   :  { %1278 = vrcp.f32 %v593_v62  ;;  %v672_v9 = vrot.slane %v671_v63, 4  ;;  %v613_v10 = vrot.slane %v612_v6, 1  ;;  %v625_v53 = vrot.slane %v624_v39, 2 }
 0x1c1   :  { %v617_v11 = vadd.f32 %v616_v0, %v615_v19  ;;  %v656_v14 = vadd.f32 %v655_v1, %v654_v45  ;;  %v669_v16 = vrot.slane %v668_v2, 1  ;;  %v661_v20 = vadd.f32 %v660_v55, %v659_v49 }
 0x1c2   :  { %v1271_v41 = vpop.eup %1270  ;;  %1280 = vrcp.f32 %v600_v3  ;;  %v606_v8 = vrot.slane %v605_v50, 1  ;;  %v681_v5 = vrot.slane %v680_v4, 2  ;;  %v673_v26 = vadd.f32 %v672_v9, %v671_v63 }
 0x1c3   :  { %v685_v12 = vsel %vm426_vm1, %v1271_v41, 0.0  ;;  %1282 = vrcp.f32 %v649_v42  ;;  %v614_v13 = vadd.f32 %v613_v10, %v612_v6  ;;  %v626_v33 = vadd.f32 %v625_v53, %v624_v39 }
 0x1c4   :  { %v1273_v25 = vpop.eup %1272  ;;  %v686_v24 = vrot.slane %v685_v12, 4  ;;  %v618_v34 = vrot.slane %v617_v11, 2  ;;  %1284 = vrcp.f32 %v656_v14  ;;  %v670_v31 = vadd.f32 %v669_v16, %v668_v2 }
 0x1c5   :  { %v629_v28 = vsel %vm426_vm1, %v1273_v25, 0.0  ;;  %731 = vperm.xlu1 %1180, %v1273_v25   ;;  %v662_v21 = vrot.slane %v661_v20, 1  ;;  %v607_v22 = vadd.f32 %v606_v8, %v605_v50  ;;  %v682_v36 = vadd.f32 %v681_v5, %v680_v4 }
 0x1c6   :  { %v1275_v32 = vpop.eup %1274  ;;  %v630_v35 = vrot.slane %v629_v28, 4  ;;  %v674_v38 = vrot.slane %v673_v26, 2  ;;  %v687_v40 = vadd.f32 %v686_v24, %v685_v12  ;;  %1286 = vrcp.f32 %v614_v13 }
 0x1c7   :  { %v1277_v7 = vpop.eup %1276  ;;  %v692_v15 = vsel %vm426_vm1, %v1275_v32, 0.0  ;;  %v627_v45 = vrot.slane %v626_v33, 1  ;;  %v619_v27 = vadd.f32 %v618_v34, %v617_v11  ;;  %1288 = vrcp.f32 %v670_v31 }
 0x1c8   :  { %v631_v23 = vadd.f32 %v630_v35, %v629_v28  ;;  %v636_v18 = vsel %vm426_vm1, %v1277_v7, 0.0  ;;  %736 = vperm.xlu0 %1181, %v1277_v7   ;;  %v693_v51 = vrot.slane %v692_v15, 4  ;;  %v663_v48 = vadd.f32 %v662_v21, %v661_v20  ;;  %v1310_v21 = vld [vmem:[#allocation2 + $0x8] sm:$0xff] }
 0x1c9   :  { %v637_v43 = vrot.slane %v636_v18, 4  ;;  %771 = vperm.xlu1 %1180, %v1271_v41   ;;  %1290 = vrcp.f32 %v607_v22  ;;  %v683_v30 = vrot.slane %v682_v36, 1  ;;  %v675_v52 = vadd.f32 %v674_v38, %v673_v26 }
 0x1ca   :  { %v632_v46 = vrot.slane %v631_v23, 2  ;;  %v1279_v29 = vpop.eup %1278  ;;  %v688_v44 = vrot.slane %v687_v40, 2  ;;  %v694_v54 = vadd.f32 %v693_v51, %v692_v15  ;;  %v628_v57 = vadd.f32 %v627_v45, %v626_v33  ;;  %v1313_v51 = vld [vmem:[#allocation2] sm:$0xff] }
 0x1cb   :  { %v638_v47 = vadd.f32 %v637_v43, %v636_v18  ;;  %v620_v58 = vrot.slane %v619_v27, 1  ;;  %1292 = vrcp.f32 %v663_v48  ;;  %v684_v56 = vadd.f32 %v683_v30, %v682_v36  ;;  %v1311_v36 = vld [vmem:[#allocation2 + $0x48] sm:$0xff]  ;;  %v1312_v18 = vld [vmem:[#allocation2 + $0x40] sm:$0xff] }
 0x1cc   :  { %776 = vperm.xlu0 %1181, %v1275_v32   ;;  %v1281_v17 = vpop.eup %1280  ;;  %v633_v49 = vadd.f32 %v632_v46, %v631_v23  ;;  %v676_v37 = vrot.slane %v675_v52, 1  ;;  %v689_v61 = vadd.f32 %v688_v44, %v687_v40  ;;  %v695_v62 = vrot.slane %v694_v54, 2 }
 0x1cd   :  { %925 = vperm.xlu1 %1180, %v1279_v29   ;;  %v639_v19 = vrot.slane %v638_v47, 2  ;;  %v1283_v59 = vpop.eup %1282  ;;  %1294 = vrcp.f32 %v628_v57  ;;  %v621_v6 = vadd.f32 %v620_v58, %v619_v27  ;;  %v1314_v27 = vld [vmem:[#allocation2 + $0x10] sm:$0xff] }
 0x1ce   :  { %v1285_v60 = vpop.eup %1284  ;;  %v634_v39 = vrot.slane %v633_v49, 1  ;;  %1296 = vrcp.f32 %v684_v56  ;;  %v677_v1 = vadd.f32 %v676_v37, %v675_v52  ;;  %v690_v2 = vrot.slane %v689_v61, 1  ;;  %v1315_v52 = vld [vmem:[#allocation2 + $0x50] sm:$0xff]  ;;  %v1317_v56 = vld [vmem:[#allocation2 + $0x18] sm:$0xff] }
 0x1cf   :  { %v640_v63 = vadd.f32 %v639_v19, %v638_v47  ;;  %v696_v55 = vadd.f32 %v695_v62, %v694_v54  ;;  %1298 = vrcp.f32 %v621_v6  ;;  %v1316_v19 = vld [vmem:[#allocation2 + $0x20] sm:$0xff]  ;;  %v1318_v6 = vld [vmem:[#allocation2 + $0x58] sm:$0xff] }
 0x1d0   :  { %930 = vperm.xlu0 %1181, %v1281_v17   ;;  %v1287_v0 = vpop.eup %1286  ;;  %v635_v50 = vadd.f32 %v634_v39, %v633_v49  ;;  %1300 = vrcp.f32 %v677_v1  ;;  %v691_v42 = vadd.f32 %v690_v2, %v689_v61 }
 0x1d1   :  { %965 = vperm.xlu1 %1180, %v1283_v59   ;;  %v1289_v41 = vpop.eup %1288  ;;  %v641_v4 = vrot.slane %v640_v63, 1  ;;  %v697_v9 = vrot.slane %v696_v55, 1 }
 0x1d2   :  { %1302 = vrcp.f32 %v635_v50 }
 0x1d3   :  { %v1291_v3 = vpop.eup %1290  ;;  %v642_v53 = vadd.f32 %v641_v4, %v640_v63  ;;  %1304 = vrcp.f32 %v691_v42  ;;  %v698_v12 = vadd.f32 %v697_v9, %v696_v55  ;;  %v1320_v4 = vld [vmem:[#allocation2 + $0x30] sm:$0xff] }
 0x1d4   :  { %970 = vperm.xlu0 %1181, %v1285_v60  }
 0x1d5   :  { %940 = vperm.xlu1 %1180, %v1287_v0   ;;  %v1293_v10 = vpop.eup %1292  ;;  %1306 = vrcp.f32 %v642_v53 }
 0x1d6   :  { %1308 = vrcp.f32 %v698_v12 }
 0x1d7   :  { %v1295_v11 = vpop.eup %1294 }
 0x1d8   :  { %980 = vperm.xlu0 %1181, %v1289_v41   ;;  %v1297_v14 = vpop.eup %1296  ;;  %v1319_v41 = vld [vmem:[#allocation2 + $0x60] sm:$0xff] }
 0x1d9   :  { %935 = vperm.xlu1 %1180, %v1291_v3   ;;  %v1299_v16 = vpop.eup %1298 }
 0x1da   :  { %v1301_v20 = vpop.eup %1300 }
 0x1dc   :  { %975 = vperm.xlu0 %1181, %v1293_v10   ;;  %v1303_v25 = vpop.eup %1302 }
 0x1dd   :  { %950 = vperm.xlu1 %1180, %v1295_v11   ;;  %v1305_v8 = vpop.eup %1304  ;;  %v1321_v11 = vld [vmem:[#allocation2 + $0x28] sm:$0xff] }
 0x1df   :  { %v1307_v5 = vpop.eup %1306 }
 0x1e0   :  { %990 = vperm.xlu0 %1181, %v1297_v14   ;;  %v1309_v26 = vpop.eup %1308 }
 0x1e1   :  { %945 = vperm.xlu1 %1180, %v1299_v16  }
 0x1e4   :  { %985 = vperm.xlu0 %1181, %v1301_v20  }
 0x1e5   :  { %955 = vperm.xlu1 %1180, %v1303_v25   ;;  %v1322_v25 = vld [vmem:[#allocation2 + $0x68] sm:$0xff] }
 0x1e8   :  { %995 = vperm.xlu0 %1181, %v1305_v8  }
 0x1e9   :  { %960 = vperm.xlu1 %1180, %v1307_v5  }
 0x1ec   :  { %1000 = vperm.xlu0 %1181, %v1309_v26  }
 0x21e   :  { %v707_v24 = vpop.permute.xlu1 %706 }
 0x21f   :  { %v747_v28 = vpop.permute.xlu0 %746  ;;  %v780_v15 = vmul.f32 %v1310_v21, %v707_v24 }
 0x220   :  { %v788_v23 = vmul.f32 %v1311_v36, %v747_v28  ;;  %v1323_v28 = vld [vmem:[#allocation2 + $0x38] sm:$0xff] }
 0x221   :  { %v802_v45 = vsel %vm56_vm0, %v780_v15, 0.0 }
 0x222   :  { %v858_v29 = vsel %vm56_vm0, %v788_v23, 0.0  ;;  %v803_v48 = vrot.slane %v802_v45, 4 }
 0x223   :  { %v742_v32 = vpop.permute.xlu1 %741  ;;  %v702_v13 = vpop.permute.xlu0 %701  ;;  %v859_v58 = vrot.slane %v858_v29, 4 }
 0x224   :  { %v787_v38 = vmul.f32 %v1312_v18, %v742_v32  ;;  %v779_v43 = vmul.f32 %v1313_v51, %v702_v13  ;;  %v804_v61 = vadd.f32 %v803_v48, %v802_v45  ;;  %v1324_v13 = vld [vmem:[#allocation2 + $0x70] sm:$0xff]  ;;  %v1325_v51 = vld [vmem:[#allocation2 + $0x78] sm:$0xff] }
 0x225   :  { %v860_v55 = vadd.f32 %v859_v58, %v858_v29 }
 0x226   :  { %v851_v47 = vsel %vm56_vm0, %v787_v38, 0.0  ;;  %v795_v30 = vsel %vm56_vm0, %v779_v43, 0.0  ;;  %v805_v14 = vrot.slane %v804_v61, 2 }
 0x227   :  { %v717_v34 = vpop.permute.xlu0 %716  ;;  %v852_v49 = vrot.slane %v851_v47, 4  ;;  %v796_v60 = vrot.slane %v795_v30, 4 }
 0x228   :  { %v782_v37 = vmul.f32 %v1317_v56, %v717_v34 }
 0x229   :  { %v853_v3 = vadd.f32 %v852_v49, %v851_v47  ;;  %v797_v9 = vadd.f32 %v796_v60, %v795_v30 }
 0x22a   :  { %v816_v10 = vsel %vm56_vm0, %v782_v37, 0.0 }
 0x22b   :  { %v757_v7 = vpop.permute.xlu0 %756  ;;  %v798_v15 = vrot.slane %v797_v9, 2 }
 0x22c   :  { %v712_v33 = vpop.permute.xlu1 %711  ;;  %v790_v39 = vmul.f32 %v1318_v6, %v757_v7  ;;  %v854_v7 = vrot.slane %v853_v3, 2 }
 0x22d   :  { %v781_v46 = vmul.f32 %v1314_v27, %v712_v33  ;;  %v799_v49 = vadd.f32 %v798_v15, %v797_v9 }
 0x22e   :  { %v872_v20 = vsel %vm56_vm0, %v790_v39, 0.0  ;;  %v855_v39 = vadd.f32 %v854_v7, %v853_v3 }
 0x22f   :  { %v809_v17 = vsel %vm56_vm0, %v781_v46, 0.0 }
 0x230   :  { %v752_v35 = vpop.permute.xlu1 %751  ;;  %v810_v62 = vrot.slane %v809_v17, 4 }
 0x231   :  { %v789_v44 = vmul.f32 %v1315_v52, %v752_v35  ;;  %v861_v35 = vrot.slane %v860_v55, 2 }
 0x232   :  { %v811_v16 = vadd.f32 %v810_v62, %v809_v17 }
 0x233   :  { %v865_v63 = vsel %vm56_vm0, %v789_v44, 0.0  ;;  %v806_v44 = vadd.f32 %v805_v14, %v804_v61  ;;  %v856_v14 = vrot.slane %v855_v39, 1 }
 0x234   :  { %v866_v53 = vrot.slane %v865_v63, 4  ;;  %v812_v18 = vrot.slane %v811_v16, 2 }
 0x235   :  { %v727_v22 = vpop.permute.xlu0 %726  ;;  %v807_v61 = vrot.slane %v806_v44, 1 }
 0x236   :  { %v784_v12 = vmul.f32 %v1321_v11, %v727_v22  ;;  %v873_v22 = vrot.slane %v872_v20, 4  ;;  %v867_v36 = vadd.f32 %v866_v53, %v865_v63 }
 0x238   :  { %v830_v23 = vsel %vm56_vm0, %v784_v12, 0.0  ;;  %v874_v17 = vadd.f32 %v873_v22, %v872_v20  ;;  %v857_v22 = vadd.f32 %v856_v14, %v855_v39 }
 0x239   :  { %v767_v54 = vpop.permute.xlu0 %766  ;;  %v831_v52 = vrot.slane %v830_v23, 4 }
 0x23a   :  { %v722_v31 = vpop.permute.xlu1 %721  ;;  %v792_v8 = vmul.f32 %v1322_v25, %v767_v54  ;;  %v862_v54 = vadd.f32 %v861_v35, %v860_v55  ;;  %v875_v55 = vrot.slane %v874_v17, 2 }
 0x23b   :  { %v783_v59 = vmul.f32 %v1316_v19, %v722_v31  ;;  %v817_v31 = vrot.slane %v816_v10, 4 }
 0x23c   :  { %v886_v38 = vsel %vm56_vm0, %v792_v8, 0.0 }
 0x23d   :  { %v823_v50 = vsel %vm56_vm0, %v783_v59, 0.0  ;;  %v818_v30 = vadd.f32 %v817_v31, %v816_v10  ;;  %v887_v58 = vrot.slane %v886_v38, 4 }
 0x23e   :  { %v762_v40 = vpop.permute.xlu1 %761  ;;  %v824_v26 = vrot.slane %v823_v50, 4 }
 0x23f   :  { %v791_v1 = vmul.f32 %v1319_v41, %v762_v40  ;;  %v819_v41 = vrot.slane %v818_v30, 2  ;;  %v888_v9 = vadd.f32 %v887_v58, %v886_v38 }
 0x240   :  { %v825_v27 = vadd.f32 %v824_v26, %v823_v50 }
 0x241   :  { %v879_v24 = vsel %vm56_vm0, %v791_v1, 0.0  ;;  %v832_v1 = vadd.f32 %v831_v52, %v830_v23  ;;  %v889_v35 = vrot.slane %v888_v9, 2 }
 0x242   :  { %v880_v40 = vrot.slane %v879_v24, 4  ;;  %v826_v62 = vrot.slane %v825_v27, 2 }
 0x243   :  { %v833_v8 = vrot.slane %v832_v1, 2  ;;  %v890_v52 = vadd.f32 %v889_v35, %v888_v9 }
 0x244   :  { %v732_v57 = vpop.permute.xlu1 %731  ;;  %v881_v19 = vadd.f32 %v880_v40, %v879_v24  ;;  %v827_v25 = vadd.f32 %v826_v62, %v825_v27  ;;  %v820_v24 = vadd.f32 %v819_v41, %v818_v30 }
 0x245   :  { %v785_v42 = vmul.f32 %v1320_v4, %v732_v57  ;;  %v868_v57 = vrot.slane %v867_v36, 2  ;;  %v800_v4 = vrot.slane %v799_v49, 1  ;;  %v834_v27 = vadd.f32 %v833_v8, %v832_v1 }
 0x246   :  { %v882_v10 = vrot.slane %v881_v19, 2 }
 0x247   :  { %v737_v0 = vpop.permute.xlu0 %736  ;;  %v837_v21 = vsel %vm56_vm0, %v785_v42, 0.0  ;;  %v869_v42 = vadd.f32 %v868_v57, %v867_v36  ;;  %v835_v62 = vrot.slane %v834_v27, 1 }
 0x248   :  { %v772_v2 = vpop.permute.xlu1 %771  ;;  %v786_v32 = vmul.f32 %v1323_v28, %v737_v0  ;;  %v838_v46 = vrot.slane %v837_v21, 4  ;;  %v813_v0 = vadd.f32 %v812_v18, %v811_v16  ;;  %v883_v15 = vadd.f32 %v882_v10, %v881_v19 }
 0x249   :  { %v793_v33 = vmul.f32 %v1324_v13, %v772_v2  ;;  %v863_v2 = vrot.slane %v862_v54, 1  ;;  %v876_v13 = vadd.f32 %v875_v55, %v874_v17  ;;  %v828_v18 = vrot.slane %v827_v25, 1 }
 0x24a   :  { %v844_v29 = vsel %vm56_vm0, %v786_v32, 0.0  ;;  %v839_v6 = vadd.f32 %v838_v46, %v837_v21  ;;  %v814_v20 = vrot.slane %v813_v0, 1  ;;  %v801_v32 = vadd.f32 %v800_v4, %v799_v49 }
 0x24b   :  { %v777_v5 = vpop.permute.xlu0 %776  ;;  %v893_v47 = vsel %vm56_vm0, %v793_v33, 0.0  ;;  %v845_v59 = vrot.slane %v844_v29, 4  ;;  %v864_v26 = vadd.f32 %v863_v2, %v862_v54  ;;  %v870_v33 = vrot.slane %v869_v42, 1 }
 0x24c   :  { %v1658_v34 = vpop.permute.xlu1 %925  ;;  %v794_v43 = vmul.f32 %v1325_v51, %v777_v5  ;;  %v894_v60 = vrot.slane %v893_v47, 4  ;;  %v840_v3 = vrot.slane %v839_v6, 2  ;;  %v808_v5 = vadd.f32 %v807_v61, %v806_v44 }
 0x24d   :  { %v846_v53 = vadd.f32 %v845_v59, %v844_v29  ;;  %v815_v36 = vadd.f32 %v814_v20, %v813_v0  ;;  %v1003_v40 = vmul.f32 %v1658_v34, %v801_v32  ;;  %v877_v29 = vrot.slane %v876_v13, 1 }
 0x24e   :  { %v900_v56 = vsel %vm56_vm0, %v794_v43, 0.0  ;;  %v895_v11 = vadd.f32 %v894_v60, %v893_v47  ;;  %v841_v38 = vadd.f32 %v840_v3, %v839_v6  ;;  %v821_v43 = vrot.slane %v820_v24, 1 }
 0x24f   :  { %v1663_v45 = vpop.permute.xlu0 %930  ;;  %v901_v50 = vrot.slane %v900_v56, 4  ;;  %v847_v7 = vrot.slane %v846_v53, 2  ;;  %v871_v30 = vadd.f32 %v870_v33, %v869_v42  ;;  %v884_v54 = vrot.slane %v883_v15, 1 }
 0x250   :  { %v1667_v48 = vpop.permute.xlu1 %965  ;;  %v896_v31 = vrot.slane %v895_v11, 2  ;;  %v1004_v51 = vmul.f32 %v1663_v45, %v808_v5  ;;  %v829_v19 = vadd.f32 %v828_v18, %v827_v25  ;;  %v842_v60 = vrot.slane %v841_v38, 1 }
 0x251   :  { %v902_v28 = vadd.f32 %v901_v50, %v900_v56  ;;  %v848_v57 = vadd.f32 %v847_v7, %v846_v53  ;;  %v1011_v58 = vmul.f32 %v1667_v48, %v857_v22  ;;  %v822_v45 = vadd.f32 %v821_v43, %v820_v24 }
 0x252   :  { %v897_v17 = vadd.f32 %v896_v31, %v895_v11  ;;  %v1036_v34 = vsel %vm1035_vm2, %v1004_v51, %v1003_v40  ;;  %v885_v1 = vadd.f32 %v884_v54, %v883_v15  ;;  %v878_v55 = vadd.f32 %v877_v29, %v876_v13 }
 0x253   :  { %v971_v37 = vpop.permute.xlu0 %970  ;;  %v903_v46 = vrot.slane %v902_v28, 2  ;;  %v849_v48 = vrot.slane %v848_v57, 1  ;;  %v891_v50 = vrot.slane %v890_v52, 1  ;;  %v843_v4 = vadd.f32 %v842_v60, %v841_v38 }
 0x254   :  { %v1670_v63 = vpop.permute.xlu1 %940  ;;  %v1012_v49 = vmul.f32 %v971_v37, %v864_v26  ;;  %v898_v2 = vrot.slane %v897_v17, 1  ;;  %v836_v10 = vadd.f32 %v835_v62, %v834_v27 }
 0x255   :  { %v904_v0 = vadd.f32 %v903_v46, %v902_v28  ;;  %v1006_v41 = vmul.f32 %v1670_v63, %v822_v45  ;;  %v850_v5 = vadd.f32 %v849_v48, %v848_v57  ;;  %v892_v26 = vadd.f32 %v891_v50, %v890_v52 }
 0x256   :  { %v1049_v37 = vsel %vm1035_vm2, %v1012_v49, %v1011_v58  ;;  %v899_v25 = vadd.f32 %v898_v2, %v897_v17 }
 0x257   :  { %v1672_v12 = vpop.permute.xlu0 %980  ;;  %v905_v20 = vrot.slane %v904_v0, 1 }
 0x258   :  { %v936_v16 = vpop.permute.xlu1 %935  ;;  %v1014_v3 = vmul.f32 %v1672_v12, %v878_v55 }
 0x259   :  { %v1005_v47 = vmul.f32 %v936_v16, %v815_v36  ;;  %v906_v31 = vadd.f32 %v905_v20, %v904_v0 }
 0x25b   :  { %v976_v21 = vpop.permute.xlu0 %975  ;;  %v1038_v6 = vsel %vm1037_vm3, %v1005_v47, %v1036_v34 }
 0x25c   :  { %v951_v23 = vpop.permute.xlu1 %950  ;;  %v1013_v56 = vmul.f32 %v976_v21, %v871_v30  ;;  %v1040_v53 = vsel %vm1039_vm4, %v1006_v41, %v1038_v6 }
 0x25d   :  { %v1008_v16 = vmul.f32 %v951_v23, %v836_v10 }
 0x25e   :  { %v1050_v9 = vsel %vm1037_vm3, %v1013_v56, %v1049_v37 }
 0x25f   :  { %v991_v44 = vpop.permute.xlu0 %990  ;;  %v1051_v24 = vsel %vm1039_vm4, %v1014_v3, %v1050_v9 }
 0x260   :  { %v946_v59 = vpop.permute.xlu1 %945  ;;  %v1016_v35 = vmul.f32 %v991_v44, %v892_v26 }
 0x261   :  { %v1007_v39 = vmul.f32 %v946_v59, %v829_v19 }
 0x263   :  { %v986_v61 = vpop.permute.xlu0 %985  ;;  %v1042_v63 = vsel %vm1041_vm5, %v1007_v39, %v1040_v53 }
 0x264   :  { %v956_v42 = vpop.permute.xlu1 %955  ;;  %v1015_v11 = vmul.f32 %v986_v61, %v885_v1  ;;  %v1044_v13 = vsel %vm1043_vm6, %v1008_v16, %v1042_v63 }
 0x265   :  { %v1009_v14 = vmul.f32 %v956_v42, %v843_v4 }
 0x266   :  { %v1052_v32 = vsel %vm1041_vm5, %v1015_v11, %v1051_v24 }
 0x267   :  { %v996_v8 = vpop.permute.xlu0 %995  ;;  %v1046_v7 = vsel %vm1045_vm7, %v1009_v14, %v1044_v13  ;;  %v1053_v22 = vsel %vm1043_vm6, %v1016_v35, %v1052_v32 }
 0x268   :  { %v961_v28 = vpop.permute.xlu1 %960  ;;  %v1017_v33 = vmul.f32 %v996_v8, %v899_v25 }
 0x269   :  { %v1010_v12 = vmul.f32 %v961_v28, %v850_v5 }
 0x26a   :  { %v1054_v23 = vsel %vm1045_vm7, %v1017_v33, %v1053_v22 }
 0x26b   :  { %v1048_v21 = vsel %vm1047_vm8, %v1010_v12, %v1046_v7  ;;  %v1001_v15 = vpop.permute.xlu0 %1000 }
 0x26c   :  { %1058 = vst.msk [vmem:[#allocation5] sm:$0xff] %vm56_vm0, %v1048_v21  ;;  %v1018_v36 = vmul.f32 %v1001_v15, %v906_v31 }
 0x26e   :  { %v1055_v18 = vsel %vm1047_vm8, %v1018_v36, %v1054_v23 }
 0x26f   :  { %1059 = vst.msk [vmem:[#allocation5 + $0x8] sm:$0xff] %vm56_vm0, %v1055_v18 }
 0x270   :  { %1359 = shalt.err (!%p1356_p12)
}
 0x271   :  { %s1360_s12 = scalar_lea.hbm %s1713_s3, 256 }
 0x272   :  { %p1361_p13 = scmp.ne.s32.totalorder %s1713_s3, %s1360_s12  ;;  %p1364_p0 = scmp.lt.u32.totalorder %s1360_s12, %s1713_s3 }
 0x274   :  { %p1366_p1 = pnand %p1364_p0, %p1361_p13 }
 0x276   :  { %1369 = shalt.err (!%p1366_p1)
}
 0x277   :  { %1071 = dma.vmem_to_hbm [thread:$0]  %s1066_s8, 256, %s1713_s3, [#allocation4], %s1375_s22, %s1375_s22, %s1376_s23  }
 0x278   :  { %1372 = dma.done.wait [#allocation4], 256  }
 0x279   :  { %1373 = vsyncadd [#allocation4], 4294967040 }
 0x27a   :  { %1075 = vsyncpa [#allocation3], 1 }
 0x27b   :  { %1076 = vsyncpa [#allocation4], 1 }

</bundles_post_ra>
